<compile_context>
chip_gen: v7x
topology: tpu7x:2x2x1
jax: 0.10.0
libtpu: 0.0.40
codegen_flags: <defaults>
</compile_context>

<pallas_src>
import functools
import numpy as np
import jax
import jax.numpy as jnp
from jax.experimental import pallas as pl
from jax.experimental.pallas import tpu as pltpu


# ----------------------------------------------------------------------------
# MADE mask construction (deterministic replica of MADE._create_masks with
# gaussian=True, random_order=False) — numpy parameter setup / glue.
# ----------------------------------------------------------------------------
def make_made_masks(n_in, hidden_dims, seed=0):
    rng = np.random.RandomState(seed)
    L = len(hidden_dims)
    D = n_in
    masks = {0: np.arange(D)}
    for l in range(L):
        low = int(masks[l].min())
        masks[l + 1] = rng.randint(low=low, high=D - 1, size=hidden_dims[l])
    masks[L + 1] = masks[0]
    mask_matrix = []
    for i in range(len(masks) - 1):
        m, m_next = masks[i], masks[i + 1]
        M = (m_next[:, None] >= m[None, :]).astype(np.float32)  # (n_out_i, n_in_i)
        mask_matrix.append(M)
    # gaussian=True: duplicate last mask along the output dim (n_out = 2 * n_in)
    last = mask_matrix.pop(-1)
    mask_matrix.append(np.concatenate([last, last], axis=0))
    return mask_matrix  # PyTorch weight layout (n_out, n_in)


def init_linear_params(key, n_in, n_out):
    # nn.Linear default init: U(-1/sqrt(n_in), 1/sqrt(n_in)) for W and b.
    kw, kb = jax.random.split(key)
    bound = 1.0 / np.sqrt(n_in)
    W = jax.random.uniform(kw, (n_out, n_in), jnp.float32, -bound, bound)
    b = jax.random.uniform(kb, (n_out,), jnp.float32, -bound, bound)
    return W, b


def _round_up(n, m):
    return ((n + m - 1) // m) * m


# ----------------------------------------------------------------------------
# Pallas kernel: fused MADE stack + (x - mu) * exp(0.5 * logp) + log-det.
# Feature-major: activations are (features, batch_tile); batch is on lanes.
# ----------------------------------------------------------------------------
def _maf_kernel(x_ref, w1_ref, b1_ref, w2_ref, b2_ref,
                w3mu_ref, b3mu_ref, w3lp_ref, b3lp_ref,
                u_ref, ld_ref, *, compute_dtype):
    cd = compute_dtype
    x32 = x_ref[...]                                   # (D, TB) float32
    xc = x32.astype(cd)                                # MXU operand

    # MaskedLinear -> ReLU -> MaskedLinear -> ReLU  (f32 accumulation on MXU)
    h1 = jnp.maximum(
        jnp.dot(w1_ref[...], xc, preferred_element_type=jnp.float32)
        + b1_ref[...], 0.0).astype(cd)                 # (H1, TB)
    h2 = jnp.maximum(
        jnp.dot(w2_ref[...], h1, preferred_element_type=jnp.float32)
        + b2_ref[...], 0.0).astype(cd)                 # (H2, TB)

    # Output layer split into sublane-aligned mu / logp heads (no offset slice).
    mu = jnp.dot(w3mu_ref[...], h2,
                 preferred_element_type=jnp.float32) + b3mu_ref[...]    # (D, TB)
    logp = jnp.dot(w3lp_ref[...], h2,
                   preferred_element_type=jnp.float32) + b3lp_ref[...]  # (D, TB)

    u_ref[...] = ((x32 - mu) * jnp.exp(0.5 * logp)).astype(u_ref.dtype)  # (D, TB)
    ld_ref[...] = 0.5 * jnp.sum(logp, axis=0, keepdims=True)             # (1, TB)


def maf_layer_forward(x, params, reverse, *, tb=2048,
                      compute_dtype=jnp.float32):
    """params: ((W1,b1),(W2,b2),(W3,b3)) with MADE masks already applied; W in
    PyTorch layout (n_out, n_in).  x: (B, D) float32.  Returns (u, log_det)."""
    B, D = x.shape
    (W1, b1), (W2, b2), (W3, b3) = params
    H1, H2 = W1.shape[0], W2.shape[0]
    cd = jnp.dtype(compute_dtype)

    # Batch tile: multiple of 128 lanes; padded batch divides evenly.
    assert tb % 128 == 0, "batch tile must be a multiple of 128 lanes"
    TB = min(tb, _round_up(B, 128))
    B_pad = _round_up(B, TB)

    # Feature-major f32 input (D, B_pad); zero-pad batch columns if needed.
    x_t = x.T.astype(jnp.float32)
    if B_pad != B:
        x_t = jnp.zeros((D, B_pad), jnp.float32).at[:, :B].set(x_t)

    # Weights stay in native (n_out, n_in) layout (we compute W @ x^T); cast
    # matmul operands to the compute dtype, keep biases in f32.
    w1 = W1.astype(cd)
    w2 = W2.astype(cd)
    w3mu = W3[:D].astype(cd)
    w3lp = W3[D:].astype(cd)
    b1c = b1.reshape(H1, 1).astype(jnp.float32)
    b2c = b2.reshape(H2, 1).astype(jnp.float32)
    b3mu = b3[:D].reshape(D, 1).astype(jnp.float32)
    b3lp = b3[D:].reshape(D, 1).astype(jnp.float32)

    grid = (B_pad // TB,)
    act_spec = pl.BlockSpec((D, TB), lambda i: (0, i))      # tiled over batch
    ld_spec = pl.BlockSpec((1, TB), lambda i: (0, i))

    def resident(shape):                                    # weights stay in VMEM
        return pl.BlockSpec(shape, lambda i: (0, 0))

    u_t, ld = pl.pallas_call(
        functools.partial(_maf_kernel, compute_dtype=cd),
        out_shape=(jax.ShapeDtypeStruct((D, B_pad), jnp.float32),
                   jax.ShapeDtypeStruct((1, B_pad), jnp.float32)),
        grid=grid,
        in_specs=[act_spec,
                  resident((H1, D)), resident((H1, 1)),
                  resident((H2, H1)), resident((H2, 1)),
                  resident((D, H2)), resident((D, 1)),
                  resident((D, H2)), resident((D, 1))],
        out_specs=(act_spec, ld_spec),
        compiler_params=pltpu.CompilerParams(
            dimension_semantics=("parallel",),
            vmem_limit_bytes=32 * 1024 * 1024),
    )(x_t, w1, b1c, w2, b2c, w3mu, b3mu, w3lp, b3lp)

    # Layout plumbing back to (B, D); optional feature flip folded here (XLA).
    u = u_t[:, :B].T
    if reverse:
        u = u[:, ::-1]
    log_det = ld[0, :B]
    return u, log_det


# ----------------------------------------------------------------------------
# Pure-JAX reference (mirrors the PyTorch forward; the MXU operand cast is
# mirrored so the bf16 compute path can be checked tightly, but the residual
# uses full-precision x just like the module).
# ----------------------------------------------------------------------------
def maf_layer_reference(x, params, reverse, compute_dtype=jnp.float32):
    (W1, b1), (W2, b2), (W3, b3) = params
    cd = jnp.dtype(compute_dtype)
    f32 = jnp.float32
    q = lambda a: a.astype(cd).astype(f32)   # simulate MXU operand precision
    dot = lambda a, b: jnp.dot(a, b, precision="highest")

    h = jnp.maximum(dot(q(x), q(W1).T) + b1, 0.0)
    h = jnp.maximum(dot(q(h), q(W2).T) + b2, 0.0)
    out = dot(q(h), q(W3).T) + b3
    D = x.shape[1]
    mu, logp = out[:, :D], out[:, D:]
    u = (x.astype(f32) - mu) * jnp.exp(0.5 * logp)
    if reverse:
        u = u[:, ::-1]
    log_det = 0.5 * jnp.sum(logp, axis=1)
    return u, log_det


if __name__ == "__main__":
    D = 8
    hidden_dims = [32, 32]

    key = jax.random.PRNGKey(0)
    kx, k1, k2, k3 = jax.random.split(key, 4)

    # Deterministic MADE masks + linear params; masks baked into the weights
    # (matches F.linear(x, mask * W, b)).
    masks = make_made_masks(D, hidden_dims, seed=0)
    dims = [D] + hidden_dims + [2 * D]
    raw = [init_linear_params(k, dims[i], dims[i + 1])
           for i, k in enumerate((k1, k2, k3))]
    params = tuple((jnp.asarray(m) * W, b) for (W, b), m in zip(raw, masks))

    # TODO(synk): only the forward pass is fused; MAFLayer.backward's
    # sequential per-dimension inversion loop is not implemented here.
    checks = [
        # (batch, reverse, compute_dtype, batch_tile, tolerance)
        (16,  True,  jnp.float32,  2048, 1e-4),   # f32 path, single tile
        (16,  False, jnp.bfloat16, 2048, 1e-4),   # bf16 MXU operands
        (300, True,  jnp.bfloat16, 128,  1e-4),   # multi-step grid (3 tiles, padded)
    ]
    for B, reverse, cdt, tb, tol in checks:
        x = jax.random.normal(jax.random.fold_in(kx, B), (B, D), jnp.float32)
        u, log_det = maf_layer_forward(x, params, reverse,
                                       tb=tb, compute_dtype=cdt)
        jax.block_until_ready((u, log_det))

        u_ref, ld_ref = maf_layer_reference(x, params, reverse, compute_dtype=cdt)
        np.testing.assert_allclose(np.asarray(u), np.asarray(u_ref),
                                   rtol=tol, atol=tol)
        np.testing.assert_allclose(np.asarray(log_det), np.asarray(ld_ref),
                                   rtol=tol, atol=tol)

    print("KERNEL_OK")
</pallas_src>

<mosaic_0001>
module attributes {stable_mosaic.version = 11 : i64} {
  func.func @_maf_kernel(%arg0: i32, %arg1: memref<8x128xf32, #tpu.memory_space<vmem>>, %arg2: memref<32x8xf32, #tpu.memory_space<vmem>>, %arg3: memref<32x1xf32, #tpu.memory_space<vmem>>, %arg4: memref<32x32xf32, #tpu.memory_space<vmem>>, %arg5: memref<32x1xf32, #tpu.memory_space<vmem>>, %arg6: memref<8x32xf32, #tpu.memory_space<vmem>>, %arg7: memref<8x1xf32, #tpu.memory_space<vmem>>, %arg8: memref<8x32xf32, #tpu.memory_space<vmem>>, %arg9: memref<8x1xf32, #tpu.memory_space<vmem>>, %arg10: memref<8x128xf32, #tpu.memory_space<vmem>>, %arg11: memref<1x128xf32, #tpu.memory_space<vmem>>) attributes {dimension_semantics = [#tpu.dimension_semantics<parallel>], iteration_bounds = array<i64: 1>, scalar_prefetch = 0 : i64, scratch_operands = 0 : i64, tpu.core_type = #tpu.core_type<tc>, window_params = [{transform_indices = @transform_0, window_bounds = array<i64: 8, 128>}, {pipeline_mode = #tpu.pipeline_mode<synchronous>, transform_indices = @transform_1, window_bounds = array<i64: 32, 8>}, {pipeline_mode = #tpu.pipeline_mode<synchronous>, transform_indices = @transform_2, window_bounds = array<i64: 32, 1>}, {pipeline_mode = #tpu.pipeline_mode<synchronous>, transform_indices = @transform_3, window_bounds = array<i64: 32, 32>}, {pipeline_mode = #tpu.pipeline_mode<synchronous>, transform_indices = @transform_4, window_bounds = array<i64: 32, 1>}, {pipeline_mode = #tpu.pipeline_mode<synchronous>, transform_indices = @transform_5, window_bounds = array<i64: 8, 32>}, {pipeline_mode = #tpu.pipeline_mode<synchronous>, transform_indices = @transform_6, window_bounds = array<i64: 8, 1>}, {pipeline_mode = #tpu.pipeline_mode<synchronous>, transform_indices = @transform_7, window_bounds = array<i64: 8, 32>}, {pipeline_mode = #tpu.pipeline_mode<synchronous>, transform_indices = @transform_8, window_bounds = array<i64: 8, 1>}, {transform_indices = @transform_9, window_bounds = array<i64: 8, 128>}, {transform_indices = @transform_10, window_bounds = array<i64: 1, 128>}]} {
    %c0 = arith.constant 0 : index
    %c0_0 = arith.constant 0 : index
    %0 = vector.load %arg1[%c0, %c0_0] : memref<8x128xf32, #tpu.memory_space<vmem>>, vector<8x128xf32>
    %c0_1 = arith.constant 0 : index
    %c0_2 = arith.constant 0 : index
    %1 = vector.load %arg2[%c0_1, %c0_2] : memref<32x8xf32, #tpu.memory_space<vmem>>, vector<32x8xf32>
    %cst = arith.constant dense<0.000000e+00> : vector<32x128xf32>
    %2 = tpu.matmul %1, %0, %cst {dimension_numbers = #tpu.dot_dimension_numbers<[1], [0], [0], [1], [0, 0, 1, 1], [], []>} : vector<32x8xf32>, vector<8x128xf32>, vector<32x128xf32> -> vector<32x128xf32>
    %c0_3 = arith.constant 0 : index
    %c0_4 = arith.constant 0 : index
    %3 = vector.load %arg3[%c0_3, %c0_4] : memref<32x1xf32, #tpu.memory_space<vmem>>, vector<32x1xf32>
    %4 = vector.broadcast %3 : vector<32x1xf32> to vector<32x128xf32>
    %5 = arith.addf %2, %4 : vector<32x128xf32>
    %cst_5 = arith.constant 0.000000e+00 : f32
    %6 = vector.broadcast %cst_5 : f32 to vector<32x128xf32>
    %7 = arith.maximumf %5, %6 : vector<32x128xf32>
    %c0_6 = arith.constant 0 : index
    %c0_7 = arith.constant 0 : index
    %8 = vector.load %arg4[%c0_6, %c0_7] : memref<32x32xf32, #tpu.memory_space<vmem>>, vector<32x32xf32>
    %cst_8 = arith.constant dense<0.000000e+00> : vector<32x128xf32>
    %9 = tpu.matmul %8, %7, %cst_8 {dimension_numbers = #tpu.dot_dimension_numbers<[1], [0], [0], [1], [0, 0, 1, 1], [], []>} : vector<32x32xf32>, vector<32x128xf32>, vector<32x128xf32> -> vector<32x128xf32>
    %c0_9 = arith.constant 0 : index
    %c0_10 = arith.constant 0 : index
    %10 = vector.load %arg5[%c0_9, %c0_10] : memref<32x1xf32, #tpu.memory_space<vmem>>, vector<32x1xf32>
    %11 = vector.broadcast %10 : vector<32x1xf32> to vector<32x128xf32>
    %12 = arith.addf %9, %11 : vector<32x128xf32>
    %cst_11 = arith.constant 0.000000e+00 : f32
    %13 = vector.broadcast %cst_11 : f32 to vector<32x128xf32>
    %14 = arith.maximumf %12, %13 : vector<32x128xf32>
    %c0_12 = arith.constant 0 : index
    %c0_13 = arith.constant 0 : index
    %15 = vector.load %arg6[%c0_12, %c0_13] : memref<8x32xf32, #tpu.memory_space<vmem>>, vector<8x32xf32>
    %cst_14 = arith.constant dense<0.000000e+00> : vector<8x128xf32>
    %16 = tpu.matmul %15, %14, %cst_14 {dimension_numbers = #tpu.dot_dimension_numbers<[1], [0], [0], [1], [0, 0, 1, 1], [], []>} : vector<8x32xf32>, vector<32x128xf32>, vector<8x128xf32> -> vector<8x128xf32>
    %c0_15 = arith.constant 0 : index
    %c0_16 = arith.constant 0 : index
    %17 = vector.load %arg7[%c0_15, %c0_16] : memref<8x1xf32, #tpu.memory_space<vmem>>, vector<8x1xf32>
    %18 = vector.broadcast %17 : vector<8x1xf32> to vector<8x128xf32>
    %19 = arith.addf %16, %18 : vector<8x128xf32>
    %c0_17 = arith.constant 0 : index
    %c0_18 = arith.constant 0 : index
    %20 = vector.load %arg8[%c0_17, %c0_18] : memref<8x32xf32, #tpu.memory_space<vmem>>, vector<8x32xf32>
    %cst_19 = arith.constant dense<0.000000e+00> : vector<8x128xf32>
    %21 = tpu.matmul %20, %14, %cst_19 {dimension_numbers = #tpu.dot_dimension_numbers<[1], [0], [0], [1], [0, 0, 1, 1], [], []>} : vector<8x32xf32>, vector<32x128xf32>, vector<8x128xf32> -> vector<8x128xf32>
    %c0_20 = arith.constant 0 : index
    %c0_21 = arith.constant 0 : index
    %22 = vector.load %arg9[%c0_20, %c0_21] : memref<8x1xf32, #tpu.memory_space<vmem>>, vector<8x1xf32>
    %23 = vector.broadcast %22 : vector<8x1xf32> to vector<8x128xf32>
    %24 = arith.addf %21, %23 : vector<8x128xf32>
    %25 = arith.subf %0, %19 : vector<8x128xf32>
    %cst_22 = arith.constant 5.000000e-01 : f32
    %26 = vector.broadcast %cst_22 : f32 to vector<8x128xf32>
    %27 = arith.mulf %26, %24 : vector<8x128xf32>
    %28 = math.exp %27 : vector<8x128xf32>
    %29 = arith.mulf %25, %28 : vector<8x128xf32>
    %c0_23 = arith.constant 0 : index
    %c0_24 = arith.constant 0 : index
    %30 = vector.load %arg10[%c0_23, %c0_24] : memref<8x128xf32, #tpu.memory_space<vmem>>, vector<8x128xf32>
    tpu.vector_store %arg10[%c0_23, %c0_24], %29 {strides = array<i32>} : memref<8x128xf32, #tpu.memory_space<vmem>>, vector<8x128xf32>,
    %cst_25 = arith.constant dense<0.000000e+00> : vector<128xf32>
    %31 = vector.multi_reduction <add>, %24, %cst_25 [0] : vector<8x128xf32> to vector<128xf32>
    %32 = vector.shape_cast %31 : vector<128xf32> to vector<1x128xf32>
    %cst_26 = arith.constant 5.000000e-01 : f32
    %33 = vector.broadcast %cst_26 : f32 to vector<1x128xf32>
    %34 = arith.mulf %33, %32 : vector<1x128xf32>
    %c0_27 = arith.constant 0 : index
    %c0_28 = arith.constant 0 : index
    %35 = vector.load %arg11[%c0_27, %c0_28] : memref<1x128xf32, #tpu.memory_space<vmem>>, vector<1x128xf32>
    tpu.vector_store %arg11[%c0_27, %c0_28], %34 {strides = array<i32>} : memref<1x128xf32, #tpu.memory_space<vmem>>, vector<1x128xf32>,
    return
  }
  func.func @transform_0(%arg0: i32) -> (i32, i32) {
    %c0_i32 = arith.constant 0 : i32
    %c0_i32_0 = arith.constant 0 : i32
    return %c0_i32, %arg0 : i32, i32
  }
  func.func @transform_1(%arg0: i32) -> (i32, i32) {
    %c0_i32 = arith.constant 0 : i32
    %c0_i32_0 = arith.constant 0 : i32
    %c0_i32_1 = arith.constant 0 : i32
    return %c0_i32, %c0_i32_0 : i32, i32
  }
  func.func @transform_2(%arg0: i32) -> (i32, i32) {
    %c0_i32 = arith.constant 0 : i32
    %c0_i32_0 = arith.constant 0 : i32
    %c0_i32_1 = arith.constant 0 : i32
    return %c0_i32, %c0_i32_0 : i32, i32
  }
  func.func @transform_3(%arg0: i32) -> (i32, i32) {
    %c0_i32 = arith.constant 0 : i32
    %c0_i32_0 = arith.constant 0 : i32
    %c0_i32_1 = arith.constant 0 : i32
    return %c0_i32, %c0_i32_0 : i32, i32
  }
  func.func @transform_4(%arg0: i32) -> (i32, i32) {
    %c0_i32 = arith.constant 0 : i32
    %c0_i32_0 = arith.constant 0 : i32
    %c0_i32_1 = arith.constant 0 : i32
    return %c0_i32, %c0_i32_0 : i32, i32
  }
  func.func @transform_5(%arg0: i32) -> (i32, i32) {
    %c0_i32 = arith.constant 0 : i32
    %c0_i32_0 = arith.constant 0 : i32
    %c0_i32_1 = arith.constant 0 : i32
    return %c0_i32, %c0_i32_0 : i32, i32
  }
  func.func @transform_6(%arg0: i32) -> (i32, i32) {
    %c0_i32 = arith.constant 0 : i32
    %c0_i32_0 = arith.constant 0 : i32
    %c0_i32_1 = arith.constant 0 : i32
    return %c0_i32, %c0_i32_0 : i32, i32
  }
  func.func @transform_7(%arg0: i32) -> (i32, i32) {
    %c0_i32 = arith.constant 0 : i32
    %c0_i32_0 = arith.constant 0 : i32
    %c0_i32_1 = arith.constant 0 : i32
    return %c0_i32, %c0_i32_0 : i32, i32
  }
  func.func @transform_8(%arg0: i32) -> (i32, i32) {
    %c0_i32 = arith.constant 0 : i32
    %c0_i32_0 = arith.constant 0 : i32
    %c0_i32_1 = arith.constant 0 : i32
    return %c0_i32, %c0_i32_0 : i32, i32
  }
  func.func @transform_9(%arg0: i32) -> (i32, i32) {
    %c0_i32 = arith.constant 0 : i32
    %c0_i32_0 = arith.constant 0 : i32
    return %c0_i32, %arg0 : i32, i32
  }
  func.func @transform_10(%arg0: i32) -> (i32, i32) {
    %c0_i32 = arith.constant 0 : i32
    %c0_i32_0 = arith.constant 0 : i32
    return %c0_i32, %arg0 : i32, i32
  }
}

</mosaic_0001>

<bundles_post_ra>
// kernel: tpu_custom_call.1
= control target key start
LH: loop header
LB: loop body
LE: loop exit
PB: predicated region body
PF: predicated region fallthrough
CT: control target
= control target key end

     0   :  { %16 = vsyncpa [#allocation3], 0  ;;  %vm65_vm0 = vcmask 64512   ;;  %v654_v5 = vmov 0   ;;  %s824_s0 = inlined_call_operand.vmem [shape: f32[8,128], index: 0, kind: input, shape index: {}]   ;;  %s825_s1 = inlined_call_operand.vmem [shape: f32[32,8], index: 1, kind: input, shape index: {}]   ;;  %s826_s2 = inlined_call_operand.vmem [shape: f32[32,1], index: 2, kind: input, shape index: {}]   ;;  %s827_s3 = inlined_call_operand.vmem [shape: f32[32,32], index: 3, kind: input, shape index: {}]   ;;  %s828_s4 = inlined_call_operand.vmem [shape: f32[32,1], index: 4, kind: input, shape index: {}]   ;;  %s829_s5 = inlined_call_operand.vmem [shape: f32[8,32], index: 5, kind: input, shape index: {}]   ;;  %s830_s6 = inlined_call_operand.vmem [shape: f32[8,1], index: 6, kind: input, shape index: {}]   ;;  %s831_s7 = inlined_call_operand.vmem [shape: f32[8,32], index: 7, kind: input, shape index: {}]   ;;  %s832_s8 = inlined_call_operand.vmem [shape: f32[8,1], index: 8, kind: input, shape index: {}]   ;;  %s833_s9 = inlined_call_operand.hbm [shape: f32[8,128], index: 9, kind: output, shape index: {0}]   ;;  %s834_s10 = inlined_call_operand.hbm [shape: f32[1,128], index: 10, kind: output, shape index: {1}]  }
   0x1   :  { %v718_v0 = vld [vmem:[%s824_s0] sm:$0xff]  ;;  %v38_v2 = vld [vmem:[%s825_s1 + $0x8] sm:$0xff]  ;;  %v39_v3 = vld [vmem:[%s825_s1 + $0x10] sm:$0xff]  ;;  %602 = vset.pattern.permute.xlu0 %v654_v5  ;;  %603 = vset.pattern.permute.xlu1 %v654_v5 }
   0x2   :  { %v37_v1 = vld [vmem:[%s825_s1] sm:$0xff]  ;;  %532 = vmatprep.subr.mxu0 %v718_v0  ;;  %v43_v6 = vld [vmem:[%s826_s2 + $0x10] sm:$0xff]  ;;  %v40_v7 = vld [vmem:[%s825_s1 + $0x18] sm:$0xff] }
   0x3   :  { %534 = vmatprep.mubr.msk.f32.mxu0 %vm65_vm0, %v37_v1  ;;  %v41_v4 = vld [vmem:[%s826_s2] sm:$0xff]  ;;  %533 = vmatpush3.msra.mxu0 %v718_v0  ;;  %v42_v8 = vld [vmem:[%s826_s2 + $0x8] sm:$0xff] }
   0x4   :  { %535 = vmatmul.mubr.msk.f32.vlgmr.msra.gmra.mrb[0].mxu0 %vm65_vm0, %v38_v2  ;;  %47 = vperm.xlu0 %602, %v41_v4  }
   0x5   :  { %537 = vmatprep.mubr.msk.f32.mxu0 %vm65_vm0, %v39_v3  ;;  %57 = vperm.xlu1 %603, %v43_v6  }
   0x6   :  { %17 = vsyncpa [#allocation5], 0  ;;  %v44_v9 = vld [vmem:[%s826_s2 + $0x18] sm:$0xff]  ;;  %v171_v10 = vld [vmem:[%s828_s4] sm:$0xff]  ;;  %vm195_vm1 = vcmask 261120   ;;  %v655_v38 = vmov 0.0|0.0  }
   0x7   :  { %v172_v11 = vld [vmem:[%s828_s4 + $0x8] sm:$0xff]  ;;  %v173_v12 = vld [vmem:[%s828_s4 + $0x10] sm:$0xff]  ;;  %v174_v13 = vld [vmem:[%s828_s4 + $0x18] sm:$0xff]  ;;  %584 = vmatprep.subr.bf16.mxu0 %v655_v38  ;;  %vm656_vm2 = vmmov 0   ;;  %v657_v39 = vmov 0.0   ;;  %s659_s27 = smov [#allocation2]  }
   0x8   :  { %538 = vmatmul.mubr.msk.f32.gmra.mrb[2].mxu0 %vm65_vm0, %v40_v7  ;;  %52 = vperm.xlu0 %602, %v42_v8   ;;  %v378_v14 = vld [vmem:[%s832_s8] sm:$0xff]  ;;  %v168_v35 = vld [vmem:[%s827_s3 + $0x8] sm:$0xff]  ;;  %v169_v36 = vld [vmem:[%s827_s3 + $0x10] sm:$0xff]  ;;  %s477_s28 = sshll.u32 %s659_s27, 4  ;;  %s793_s28 = int_to_ptr.vmem [resolvable:$true] %s477_s28 }
   0x9   :  { %62 = vperm.xlu1 %603, %v44_v9   ;;  %v298_v15 = vld [vmem:[%s830_s6] sm:$0xff]  ;;  %v170_v37 = vld [vmem:[%s827_s3 + $0x18] sm:$0xff]  ;;  %562 = vmatprep.mubr.msk.f32.mxu0 %vm656_vm2, %v657_v39 }
   0xa   :  { %v167_v16 = vld [vmem:[%s827_s3] sm:$0xff] }
   0xb   :  { %548 = vmatprep.mubr.msk.f32.mxu1 %vm195_vm1, %v167_v16  ;;  %v297_v58 = vld [vmem:[%s829_s5] sm:$0xff]  ;;  %s658_s5 = smov [#allocation4]  }
   0xc   :  { %177 = vperm.xlu0 %602, %v171_v10   ;;  %v377_v59 = vld [vmem:[%s831_s7] sm:$0xff]  ;;  %s487_s7 = sshll.u32 %s658_s5, 4  ;;  %s488_s7 = int_to_ptr.vmem [resolvable:$true] %s487_s7 }
   0xd   :  { %182 = vperm.xlu1 %603, %v172_v11   ;;  %s606_s29 = scalar_lea.vmem %s488_s7, 16  ;;  %s610_s30 = scalar_lea.vmem %s488_s7, 32 }
   0xe   :  { %p607_p0 = scmp.ne.s32.totalorder %s488_s7, %s606_s29  ;;  %p611_p1 = scmp.lt.s32.totalorder %s488_s7, %s488_s7 }
   0xf   :  { %p612_p2 = scmp.lt.s32.totalorder %s610_s30, %s606_s29 }
  0x10   :  { %187 = vperm.xlu0 %602, %v173_v12  }
  0x11   :  { %192 = vperm.xlu1 %603, %v174_v13   ;;  %p613_p3 = por %p612_p2, %p611_p1 }
  0x13   :  { %p614_p4 = pnand %p613_p3, %p607_p0 }
  0x14   :  { %381 = vperm.xlu0 %602, %v378_v14  }
  0x15   :  { %301 = vperm.xlu1 %603, %v298_v15  }
  0x83   :  { %v48_v17 = vpop.permute.xlu0 %47 }
  0x84   :  { %v58_v18 = vpop.permute.xlu1 %57 }
  0x87   :  { %v53_v19 = vpop.permute.xlu0 %52 }
  0x88   :  { %v63_v25 = vpop.permute.xlu1 %62 }
  0x8b   :  { %v178_v41 = vpop.permute.xlu0 %177 }
  0x8c   :  { %v183_v40 = vpop.permute.xlu1 %182 }
  0x8f   :  { %v188_v50 = vpop.permute.xlu0 %187 }
  0x90   :  { %v193_v47 = vpop.permute.xlu1 %192 }
  0x93   :  { %v382_v60 = vpop.permute.xlu0 %381 }
  0x94   :  { %v302_v9 = vpop.permute.xlu1 %301 }
  0xd7   :  { %v536_v20 = vpop.f32.mrb[0].mxu0 }
  0xd8   :  { %v150_v21 = vadd.f32 %v536_v20, %v53_v19  ;;  %v144_v22 = vpop.f32.mrb[1].mxu0 }
  0xd9   :  { %v145_v23 = vadd.f32 %v144_v22, %v48_v17 }
  0xda   :  { %v164_v24 = vmax.f32 %v150_v21, 0.0 }
  0xdb   :  { %v163_v26 = vmax.f32 %v145_v23, 0.0  ;;  %v539_v27 = vpop.f32.mrb[2].mxu0 }
  0xdc   :  { %v160_v28 = vadd.f32 %v539_v27, %v63_v25  ;;  %v154_v29 = vpop.f32.mrb[3].mxu0 }
  0xdd   :  { %v155_v30 = vadd.f32 %v154_v29, %v58_v18  ;;  %v576_v31 = vpack.c.bf16 %v164_v24, %v163_v26 }
  0xde   :  { %v166_v32 = vmax.f32 %v160_v28, 0.0 }
  0xdf   :  { %v165_v33 = vmax.f32 %v155_v30, 0.0  ;;  %577 = vmatprep.subr.bf16.mxu1 %v576_v31 }
  0xe0   :  { %579 = vmatpush3.bf16.msra.mxu1 %v576_v31 }
  0xe1   :  { %v580_v34 = vpack.c.bf16 %v166_v32, %v165_v33 }
  0xe3   :  { %581 = vmatprep.subr.bf16.mxu1 %v580_v34 }
  0xe4   :  { %583 = vmatpush3.bf16.msra.mxu1 %v580_v34 }
  0xe5   :  { %590 = vmatprep.subr.bf16.mxu1 %v655_v38 }
  0xe7   :  { %549 = vmatmul.mubr.msk.f32.vlgmr.msra.gmra.mrb[0].mxu1 %vm195_vm1, %v168_v35 }
  0xe8   :  { %551 = vmatprep.mubr.msk.f32.mxu1 %vm195_vm1, %v169_v36 }
  0xeb   :  { %552 = vmatmul.mubr.msk.f32.gmra.mrb[2].mxu1 %vm195_vm1, %v170_v37 }
  0xec   :  { %573 = vmatprep.mubr.msk.f32.mxu1 %vm656_vm2, %v657_v39 }
 0x1ba   :  { %v550_v42 = vpop.f32.mrb[0].mxu1 }
 0x1bb   :  { %v280_v43 = vadd.f32 %v550_v42, %v183_v40  ;;  %v274_v44 = vpop.f32.mrb[1].mxu1 }
 0x1bc   :  { %v275_v45 = vadd.f32 %v274_v44, %v178_v41 }
 0x1bd   :  { %v294_v46 = vmax.f32 %v280_v43, 0.0 }
 0x1be   :  { %v293_v48 = vmax.f32 %v275_v45, 0.0  ;;  %v553_v49 = vpop.f32.mrb[2].mxu1 }
 0x1bf   :  { %v290_v51 = vadd.f32 %v553_v49, %v193_v47  ;;  %v284_v52 = vpop.f32.mrb[3].mxu1 }
 0x1c0   :  { %v585_v53 = vpack.c.bf16 %v294_v46, %v293_v48  ;;  %v285_v54 = vadd.f32 %v284_v52, %v188_v50 }
 0x1c1   :  { %v296_v55 = vmax.f32 %v290_v51, 0.0 }
 0x1c2   :  { %v295_v56 = vmax.f32 %v285_v54, 0.0  ;;  %586 = vmatpush3.bf16.msra.mxu0 %v585_v53  ;;  %592 = vmatpush3.bf16.msra.mxu1 %v585_v53 }
 0x1c3   :  { %587 = vmatprep.subr.bf16.mxu0 %v655_v38  ;;  %593 = vmatprep.subr.bf16.mxu1 %v655_v38 }
 0x1c4   :  { %v588_v57 = vpack.c.bf16 %v296_v55, %v295_v56 }
 0x1c6   :  { %589 = vmatpush3.bf16.msra.mxu0 %v588_v57  ;;  %595 = vmatpush3.bf16.msra.mxu1 %v588_v57 }
 0x1c9   :  { %563 = vmatmul.mubr.msk.f32.vlgmr.msra.gmra.mrb[4].mxu0 %vm195_vm1, %v297_v58  ;;  %574 = vmatmul.mubr.msk.f32.vlgmr.msra.gmra.mrb[4].mxu1 %vm195_vm1, %v377_v59 }
 0x29c   :  { %v373_v61 = vpop.f32.mrb[4].mxu0  ;;  %v453_v62 = vpop.f32.mrb[4].mxu1 }
 0x29d   :  { %v454_v63 = vadd.f32 %v453_v62, %v382_v60  ;;  %v575_v1 = vpop.f32.mrb[5].mxu1  ;;  %v564_v2 = vpop.f32.mrb[5].mxu0  ;;  %v374_v11 = vadd.f32 %v373_v61, %v302_v9 }
 0x29f   :  { %v458_v3 = vmul.f32 0.5, %v454_v63  ;;  %v463_v4 = vrot.slane %v454_v63, 4  ;;  %v457_v14 = vsub.f32 %v718_v0, %v374_v11 }
 0x2a1   :  { %v459_v5 = vmul.f32 1.442695, %v458_v3  ;;  %v464_v6 = vadd.f32 %v463_v4, %v454_v63 }
 0x2a3   :  { %604 = vpow2.f32 %v459_v5  ;;  %v465_v7 = vrot.slane %v464_v6, 2 }
 0x2a5   :  { %v466_v8 = vadd.f32 %v465_v7, %v464_v6 }
 0x2a7   :  { %v467_v10 = vrot.slane %v466_v8, 1 }
 0x2a9   :  { %v468_v12 = vadd.f32 %v467_v10, %v466_v8 }
 0x2ab   :  { %v469_v13 = vmul.f32 0.5, %v468_v12 }
 0x2ad   :  { %v605_v15 = vpop.eup %604  ;;  %470 = vst [vmem:[#allocation4] sm:$0x1] %v469_v13 }
 0x2ae   :  { %v461_v16 = vmul.f32 %v605_v15, %v457_v14 }
 0x2af   :  { %617 = shalt.err (!%p614_p4)
}
 0x2b0   :  { %s618_s12 = scalar_lea.hbm %s834_s10, 16 }
 0x2b1   :  { %p619_p5 = scmp.ne.s32.totalorder %s834_s10, %s618_s12  ;;  %p622_p6 = scmp.lt.u32.totalorder %s618_s12, %s834_s10 }
 0x2b3   :  { %p624_p7 = pnand %p622_p6, %p619_p5 }
 0x2b5   :  { %627 = shalt.err (!%p624_p7)
}
 0x2b6   :  { %490 = dma.vmem_to_hbm [thread:$0]  %s488_s7, 16, %s834_s10, [#allocation5]   ;;  %462 = vst [vmem:[#allocation2] sm:$0xff] %v461_v16 }
 0x2b7   :  { %s628_s18 = scalar_lea.vmem %s793_s28, 128  ;;  %p633_p9 = scmp.lt.s32.totalorder %s793_s28, %s793_s28 }
 0x2b8   :  { %p629_p8 = scmp.ne.s32.totalorder %s793_s28, %s628_s18  ;;  %p634_p10 = scmp.lt.s32.totalorder %s628_s18, %s628_s18 }
 0x2ba   :  { %p635_p11 = por %p634_p10, %p633_p9 }
 0x2bc   :  { %p636_p12 = pnand %p635_p11, %p629_p8 }
 0x2be   :  { %639 = shalt.err (!%p636_p12)
}
 0x2bf   :  { %s640_s21 = scalar_lea.hbm %s833_s9, 128 }
 0x2c0   :  { %p641_p13 = scmp.ne.s32.totalorder %s833_s9, %s640_s21  ;;  %p644_p0 = scmp.lt.u32.totalorder %s640_s21, %s833_s9 }
 0x2c2   :  { %p646_p1 = pnand %p644_p0, %p641_p13 }
 0x2c4   :  { %649 = shalt.err (!%p646_p1)
}
 0x2c5   :  { %480 = dma.vmem_to_hbm [thread:$0]  %s793_s28, 128, %s833_s9, [#allocation3]  }
 0x2c6   :  { %650 = dma.done.wait [#allocation3], 128  }
 0x2c7   :  { %651 = vsyncadd [#allocation3], 4294967168 }
 0x2c8   :  { %652 = dma.done.wait [#allocation5], 16  }
 0x2c9   :  { %653 = vsyncadd [#allocation5], 4294967280 }
 0x2ca   :  { %497 = vsyncpa [#allocation3], 1 }
 0x2cb   :  { %498 = vsyncpa [#allocation5], 1 }

</bundles_post_ra>
